<compile_context>
chip_gen: v7x
topology: tpu7x:2x2x1
jax: 0.10.0
libtpu: 0.0.40
codegen_flags: <defaults>
</compile_context>

<pallas_src>
import jax
import jax.numpy as jnp
from jax.experimental import pallas as pl
from jax.experimental.pallas import tpu as pltpu

LN_EPS = 1e-5  # torch.nn.LayerNorm default


def _dot_f32x2(a_f32, b_bf16):
    """~f32-accurate a @ b using two bf16 MXU passes.

    `b` must be exactly representable in bf16 (true for the 1/Dout group-mean
    matrix).  Used only for the LayerNorm statistic reductions so their
    accuracy does not depend on the MXU operand precision."""
    a_hi = a_f32.astype(jnp.bfloat16)
    a_lo = (a_f32 - a_hi.astype(jnp.float32)).astype(jnp.bfloat16)
    hi = jnp.dot(a_hi, b_bf16, preferred_element_type=jnp.float32)
    lo = jnp.dot(a_lo, b_bf16, preferred_element_type=jnp.float32)
    return hi + lo


def _fused_residual3d_kernel(x_ref,
                             wfi_ref, bfi_ref, wf2_ref, gmean_ref, fvecs_ref,
                             wci_ref, wc2t_ref, cvecs_ref,
                             o_ref):
    """Bt batch elements: (Bt, I, S*Din) -> (Bt, I, S*Dout), both residual
    blocks fused, output already in the final (permuted-back) layout."""
    f32, bf16 = jnp.float32, jnp.bfloat16
    Bt, I, SDin = x_ref.shape
    SH, SDout = wf2_ref.shape
    Hc = wc2t_ref.shape[1]

    # ---- forward block: features on lanes, block-diagonal (kron) weights ---
    # M = Bt*I rows through the MXU; merged dense+skip matmul; bf16 operands,
    # f32 accumulation.
    x = x_ref[...].reshape(Bt * I, SDin).astype(bf16)
    t = jnp.dot(x, wfi_ref[...], preferred_element_type=f32) + bfi_ref[...]
    h = jnp.maximum(t[:, :SH], 0.0)                       # (Bt*I, S*H)
    skip = t[:, SH:]                                      # (Bt*I, S*Dout), biases folded
    y = jnp.dot(h.astype(bf16), wf2_ref[...], preferred_element_type=f32) + skip

    # LayerNorm over each Dout-sized lane group; group means as compensated
    # bf16x2 matmuls on the MXU, elementwise math in f32 on the VPU.
    gmean = gmean_ref[...]
    mean = _dot_f32x2(y, gmean)
    cen = y - mean
    var = _dot_f32x2(cen * cen, gmean)
    fv = fvecs_ref[...]
    y = cen * jax.lax.rsqrt(var + LN_EPS) * fv[0:1, :] + fv[1:2, :]

    # ---- cross block: ins axis on sublanes, transposed weights -------------
    wci = wci_ref[...]                                    # (Hc+I, I)  bf16
    wc2t = wc2t_ref[...]                                  # (I, Hc)    bf16
    cv = cvecs_ref[...]                                   # (Hc+3I, 1) f32
    bci = cv[:Hc + I, :]
    gct = cv[Hc + I:Hc + 2 * I, :]
    bct = cv[Hc + 2 * I:Hc + 3 * I, :]
    # Static unrolled loop over the Bt batch slabs; the same tiny cross
    # weights cover all of them (hoisted out of the loop).
    for b in range(Bt):
        yb = y[b * I:(b + 1) * I, :]                      # (I, S*Dout) f32
        tc = jnp.dot(wci, yb.astype(bf16), preferred_element_type=f32) + bci
        hcb = jnp.maximum(tc[:Hc, :], 0.0)
        skc = tc[Hc:, :]                                  # biases folded
        z = jnp.dot(wc2t, hcb.astype(bf16), preferred_element_type=f32) + skc
        # LayerNorm over the ins axis (sublane reduction, exact f32).
        mz = jnp.mean(z, axis=0, keepdims=True)
        cz = z - mz
        vz = jnp.mean(cz * cz, axis=0, keepdims=True)
        o_ref[b] = (cz * jax.lax.rsqrt(vz + LN_EPS) * gct + bct).astype(o_ref.dtype)


# ------------------------- one-time weight packing ---------------------------

def pack_residual3d_params(fwd_params, cross_params, seq_len):
    """One-time packing of the module weights into the kernel layout (hoisted
    out of the forward path).  MXU operands in bf16, bias/LN vectors in f32."""
    S = seq_len
    f32, bf16 = jnp.float32, jnp.bfloat16
    w1, b1, w2, b2, ws, bs, gamma, beta = [jnp.asarray(p, f32) for p in fwd_params]
    wc1, bc1, wc2, bc2, wcs, bcs, gammac, betac = [jnp.asarray(p, f32) for p in cross_params]
    Dout = w2.shape[1]

    eye_s = jnp.eye(S, dtype=f32)
    # merged dense+skip weight, block-diagonal over the S time steps
    wfi = jnp.concatenate([jnp.kron(eye_s, w1), jnp.kron(eye_s, ws)], axis=1).astype(bf16)
    # dense bias || (skip bias + 2nd dense bias): b2 folded into bs
    bfi = jnp.concatenate([jnp.tile(b1, (1, S)), jnp.tile(bs + b2, (1, S))], axis=1)
    wf2 = jnp.kron(eye_s, w2).astype(bf16)
    # group-mean matrix for the per-time-step LayerNorm (1/Dout is bf16-exact)
    gmean = jnp.kron(eye_s, jnp.full((Dout, Dout), 1.0 / Dout, f32)).astype(bf16)
    fvecs = jnp.concatenate([jnp.tile(gamma, (1, S)), jnp.tile(beta, (1, S))], axis=0)

    # cross block: transposed, dense+skip stacked; bc2 folded into bcs
    wci = jnp.concatenate([wc1.T, wcs.T], axis=0).astype(bf16)                  # (Hc+I, I)
    wc2t = wc2.T.astype(bf16)                                                   # (I, Hc)
    cvecs = jnp.concatenate([bc1.T, (bcs + bc2).T, gammac.T, betac.T], axis=0)  # (Hc+3I, 1)
    return (wfi, bfi, wf2, gmean, fvecs, wci, wc2t, cvecs)


def _pick_block_batch(batch, requested=None, max_block=8):
    """Largest divisor of `batch` (<= max_block) that still leaves >= 2 grid
    steps, so both v7x TensorCores get work while M = Bt*ins_dim stays big."""
    if requested is not None:
        if batch % requested:
            raise ValueError(f"block_batch={requested} must divide batch={batch}")
        return requested
    for cand in range(min(batch, max_block), 0, -1):
        if batch % cand == 0 and (batch // cand >= 2 or batch == 1):
            return cand
    return 1


def residual_3d_block(x, packed_params, block_batch=None):
    """x: (B, ins_dim, S, input_dim) -> (B, ins_dim, S, output_dim)."""
    B, I, S, Din = x.shape
    wfi, bfi, wf2, gmean, fvecs, wci, wc2t, cvecs = packed_params
    SDin = S * Din
    SH, SDout = wf2.shape
    Dout = SDout // S
    Hc = wc2t.shape[1]
    assert wfi.shape == (SDin, SH + SDout), (wfi.shape, SDin, SH, SDout)
    Bt = _pick_block_batch(B, block_batch)

    x2 = x.reshape(B, I, SDin)                  # free reshape, no transpose

    full = lambda a: pl.BlockSpec(a.shape, lambda g: (0, 0))

    # Advisory cost hint for the XLA scheduler.
    weights = (wfi, bfi, wf2, gmean, fvecs, wci, wc2t, cvecs)
    flops = (2 * B * I * (SDin * (SH + SDout) + SH * SDout + 4 * SDout * SDout)
             + 2 * B * ((Hc + I) * I * SDout + I * Hc * SDout))
    bytes_accessed = (x2.size * x2.dtype.itemsize + B * I * SDout * 4
                      + sum(w.size * w.dtype.itemsize for w in weights))
    cost = pl.CostEstimate(flops=int(flops),
                           transcendentals=int(B * (I + 1) * SDout),
                           bytes_accessed=int(bytes_accessed))

    out = pl.pallas_call(
        _fused_residual3d_kernel,
        out_shape=jax.ShapeDtypeStruct((B, I, SDout), x.dtype),
        grid_spec=pltpu.PrefetchScalarGridSpec(
            num_scalar_prefetch=0,
            grid=(B // Bt,),
            in_specs=[
                pl.BlockSpec((Bt, I, SDin), lambda g: (g, 0, 0)),   # x (Bt batches)
                full(wfi), full(bfi), full(wf2), full(gmean), full(fvecs),
                full(wci), full(wc2t), full(cvecs),
            ],
            out_specs=pl.BlockSpec((Bt, I, SDout), lambda g: (g, 0, 0)),
        ),
        compiler_params=pltpu.CompilerParams(
            dimension_semantics=("parallel",),
            vmem_limit_bytes=32 * 1024 * 1024),
        cost_estimate=cost,
    )(x2, wfi, bfi, wf2, gmean, fvecs, wci, wc2t, cvecs)

    # Output is already in the final (B, ins_dim, S, Dout) layout.
    return out.reshape(B, I, S, Dout)


# ----------------------------- reference ------------------------------------

def make_residual_block_params(key, input_dim, output_dim, hidden_size):
    """Deterministic synthetic params mimicking nn.Linear / nn.LayerNorm shapes.
    Weights are stored already transposed to (in, out) for x @ W."""
    ks = jax.random.split(key, 6)

    def lin(kw, kb, fan_in, fan_out):
        bound = 1.0 / jnp.sqrt(fan_in)
        w = jax.random.uniform(kw, (fan_in, fan_out), jnp.float32, -bound, bound)
        b = jax.random.uniform(kb, (1, fan_out), jnp.float32, -bound, bound)
        return w, b

    w1, b1 = lin(ks[0], ks[1], input_dim, hidden_size)
    w2, b2 = lin(ks[2], ks[3], hidden_size, output_dim)
    ws, bs = lin(ks[4], ks[5], input_dim, output_dim)
    gamma = jnp.ones((1, output_dim), jnp.float32)
    beta = jnp.zeros((1, output_dim), jnp.float32)
    return (w1, b1, w2, b2, ws, bs, gamma, beta)


def _residual_block_ref(x2d, params):
    w1, b1, w2, b2, ws, bs, gamma, beta = params
    h = jnp.maximum(x2d @ w1 + b1, 0.0)
    y = (h @ w2 + b2) + (x2d @ ws + bs)
    mean = jnp.mean(y, axis=-1, keepdims=True)
    var = jnp.mean((y - mean) ** 2, axis=-1, keepdims=True)
    return (y - mean) / jnp.sqrt(var + LN_EPS) * gamma + beta


def residual_3d_block_ref(x, fwd_params, cross_params):
    B, I, S, Din = x.shape
    y = _residual_block_ref(x.reshape(B * I * S, Din), fwd_params)
    Dout = y.shape[-1]
    y = y.reshape(B, I, S, Dout)
    yp = jnp.transpose(y, (0, 2, 3, 1))
    z = _residual_block_ref(yp.reshape(B * S * Dout, I), cross_params)
    z = z.reshape(B, S, Dout, I)
    return jnp.transpose(z, (0, 3, 1, 2))


if __name__ == "__main__":
    # module hyper-params (small, consistent with _Residual3DBlock.__init__)
    input_dim, output_dim, hidden_size = 16, 16, 32
    ins_dim, ins_hidden_size = 8, 32
    B, S = 4, 8  # batch, sequence

    key = jax.random.PRNGKey(0)
    k_x, k_fwd, k_cross = jax.random.split(key, 3)

    x = jax.random.normal(k_x, (B, ins_dim, S, input_dim), jnp.float32)
    fwd_params = make_residual_block_params(k_fwd, input_dim, output_dim,
                                            hidden_size)
    cross_params = make_residual_block_params(k_cross, ins_dim, ins_dim,
                                              ins_hidden_size)

    # One-time weight packing, hoisted out of the forward path.
    packed = pack_residual3d_params(fwd_params, cross_params, seq_len=S)

    run = jax.jit(residual_3d_block)
    out = jax.block_until_ready(run(x, packed))

    ref = residual_3d_block_ref(x, fwd_params, cross_params)
    assert out.shape == (B, ins_dim, S, output_dim), out.shape
    diff = jnp.sqrt(jnp.sum((out - ref) ** 2))
    denom = jnp.sqrt(jnp.sum(ref ** 2))
    rel = float(diff / denom)
    assert rel < 3e-2, f"relative error too large vs reference: {rel}"

    print("KERNEL_OK")
</pallas_src>

<mosaic_0001>
module attributes {stable_mosaic.version = 11 : i64} {
  func.func @_fused_residual3d_kernel(%arg0: i32, %arg1: memref<2x8x128xf32, #tpu.memory_space<vmem>>, %arg2: memref<128x384xbf16, #tpu.memory_space<vmem>>, %arg3: memref<1x384xf32, #tpu.memory_space<vmem>>, %arg4: memref<256x128xbf16, #tpu.memory_space<vmem>>, %arg5: memref<128x128xbf16, #tpu.memory_space<vmem>>, %arg6: memref<2x128xf32, #tpu.memory_space<vmem>>, %arg7: memref<40x8xbf16, #tpu.memory_space<vmem>>, %arg8: memref<8x32xbf16, #tpu.memory_space<vmem>>, %arg9: memref<56x1xf32, #tpu.memory_space<vmem>>, %arg10: memref<2x8x128xf32, #tpu.memory_space<vmem>>) attributes {dimension_semantics = [#tpu.dimension_semantics<parallel>], iteration_bounds = array<i64: 2>, scalar_prefetch = 0 : i64, scratch_operands = 0 : i64, tpu.core_type = #tpu.core_type<tc>, window_params = [{transform_indices = @transform_0, window_bounds = array<i64: 2, 8, 128>}, {pipeline_mode = #tpu.pipeline_mode<synchronous>, transform_indices = @transform_1, window_bounds = array<i64: 128, 384>}, {pipeline_mode = #tpu.pipeline_mode<synchronous>, transform_indices = @transform_2, window_bounds = array<i64: 1, 384>}, {pipeline_mode = #tpu.pipeline_mode<synchronous>, transform_indices = @transform_3, window_bounds = array<i64: 256, 128>}, {pipeline_mode = #tpu.pipeline_mode<synchronous>, transform_indices = @transform_4, window_bounds = array<i64: 128, 128>}, {pipeline_mode = #tpu.pipeline_mode<synchronous>, transform_indices = @transform_5, window_bounds = array<i64: 2, 128>}, {pipeline_mode = #tpu.pipeline_mode<synchronous>, transform_indices = @transform_6, window_bounds = array<i64: 40, 8>}, {pipeline_mode = #tpu.pipeline_mode<synchronous>, transform_indices = @transform_7, window_bounds = array<i64: 8, 32>}, {pipeline_mode = #tpu.pipeline_mode<synchronous>, transform_indices = @transform_8, window_bounds = array<i64: 56, 1>}, {transform_indices = @transform_9, window_bounds = array<i64: 2, 8, 128>}]} {
    %c0 = arith.constant 0 : index
    %c0_0 = arith.constant 0 : index
    %c0_1 = arith.constant 0 : index
    %0 = vector.load %arg1[%c0, %c0_0, %c0_1] : memref<2x8x128xf32, #tpu.memory_space<vmem>>, vector<2x8x128xf32>
    %1 = vector.shape_cast %0 : vector<2x8x128xf32> to vector<16x128xf32>
    %2 = arith.truncf %1 : vector<16x128xf32> to vector<16x128xbf16>
    %c0_2 = arith.constant 0 : index
    %c0_3 = arith.constant 0 : index
    %3 = vector.load %arg2[%c0_2, %c0_3] : memref<128x384xbf16, #tpu.memory_space<vmem>>, vector<128x384xbf16>
    %cst = arith.constant dense<0.000000e+00> : vector<16x384xf32>
    %4 = tpu.matmul %2, %3, %cst {dimension_numbers = #tpu.dot_dimension_numbers<[1], [0], [0], [1], [0, 0, 1, 1], [], []>} : vector<16x128xbf16>, vector<128x384xbf16>, vector<16x384xf32> -> vector<16x384xf32>
    %c0_4 = arith.constant 0 : index
    %c0_5 = arith.constant 0 : index
    %5 = vector.load %arg3[%c0_4, %c0_5] : memref<1x384xf32, #tpu.memory_space<vmem>>, vector<1x384xf32>
    %6 = vector.broadcast %5 : vector<1x384xf32> to vector<16x384xf32>
    %7 = arith.addf %4, %6 : vector<16x384xf32>
    %8 = vector.extract_strided_slice %7 {offsets = [0, 0], sizes = [16, 256], strides = [1, 1]} : vector<16x384xf32> to vector<16x256xf32>
    %cst_6 = arith.constant 0.000000e+00 : f32
    %9 = vector.broadcast %cst_6 : f32 to vector<16x256xf32>
    %10 = arith.maximumf %8, %9 : vector<16x256xf32>
    %11 = vector.extract_strided_slice %7 {offsets = [0, 256], sizes = [16, 128], strides = [1, 1]} : vector<16x384xf32> to vector<16x128xf32>
    %12 = arith.truncf %10 : vector<16x256xf32> to vector<16x256xbf16>
    %c0_7 = arith.constant 0 : index
    %c0_8 = arith.constant 0 : index
    %13 = vector.load %arg4[%c0_7, %c0_8] : memref<256x128xbf16, #tpu.memory_space<vmem>>, vector<256x128xbf16>
    %cst_9 = arith.constant dense<0.000000e+00> : vector<16x128xf32>
    %14 = tpu.matmul %12, %13, %cst_9 {dimension_numbers = #tpu.dot_dimension_numbers<[1], [0], [0], [1], [0, 0, 1, 1], [], []>} : vector<16x256xbf16>, vector<256x128xbf16>, vector<16x128xf32> -> vector<16x128xf32>
    %15 = arith.addf %14, %11 : vector<16x128xf32>
    %c0_10 = arith.constant 0 : index
    %c0_11 = arith.constant 0 : index
    %16 = vector.load %arg5[%c0_10, %c0_11] : memref<128x128xbf16, #tpu.memory_space<vmem>>, vector<128x128xbf16>
    %17 = arith.truncf %15 : vector<16x128xf32> to vector<16x128xbf16>
    %18 = arith.extf %17 : vector<16x128xbf16> to vector<16x128xf32>
    %19 = arith.subf %15, %18 : vector<16x128xf32>
    %20 = arith.truncf %19 : vector<16x128xf32> to vector<16x128xbf16>
    %cst_12 = arith.constant dense<0.000000e+00> : vector<16x128xf32>
    %21 = tpu.matmul %17, %16, %cst_12 {dimension_numbers = #tpu.dot_dimension_numbers<[1], [0], [0], [1], [0, 0, 1, 1], [], []>} : vector<16x128xbf16>, vector<128x128xbf16>, vector<16x128xf32> -> vector<16x128xf32>
    %cst_13 = arith.constant dense<0.000000e+00> : vector<16x128xf32>
    %22 = tpu.matmul %20, %16, %cst_13 {dimension_numbers = #tpu.dot_dimension_numbers<[1], [0], [0], [1], [0, 0, 1, 1], [], []>} : vector<16x128xbf16>, vector<128x128xbf16>, vector<16x128xf32> -> vector<16x128xf32>
    %23 = arith.addf %21, %22 : vector<16x128xf32>
    %24 = arith.subf %15, %23 : vector<16x128xf32>
    %25 = arith.mulf %24, %24 : vector<16x128xf32>
    %26 = arith.truncf %25 : vector<16x128xf32> to vector<16x128xbf16>
    %27 = arith.extf %26 : vector<16x128xbf16> to vector<16x128xf32>
    %28 = arith.subf %25, %27 : vector<16x128xf32>
    %29 = arith.truncf %28 : vector<16x128xf32> to vector<16x128xbf16>
    %cst_14 = arith.constant dense<0.000000e+00> : vector<16x128xf32>
    %30 = tpu.matmul %26, %16, %cst_14 {dimension_numbers = #tpu.dot_dimension_numbers<[1], [0], [0], [1], [0, 0, 1, 1], [], []>} : vector<16x128xbf16>, vector<128x128xbf16>, vector<16x128xf32> -> vector<16x128xf32>
    %cst_15 = arith.constant dense<0.000000e+00> : vector<16x128xf32>
    %31 = tpu.matmul %29, %16, %cst_15 {dimension_numbers = #tpu.dot_dimension_numbers<[1], [0], [0], [1], [0, 0, 1, 1], [], []>} : vector<16x128xbf16>, vector<128x128xbf16>, vector<16x128xf32> -> vector<16x128xf32>
    %32 = arith.addf %30, %31 : vector<16x128xf32>
    %c0_16 = arith.constant 0 : index
    %c0_17 = arith.constant 0 : index
    %33 = vector.load %arg6[%c0_16, %c0_17] : memref<2x128xf32, #tpu.memory_space<vmem>>, vector<2x128xf32>
    %cst_18 = arith.constant 9.99999974E-6 : f32
    %34 = vector.broadcast %cst_18 : f32 to vector<16x128xf32>
    %35 = arith.addf %32, %34 : vector<16x128xf32>
    %36 = math.rsqrt %35 : vector<16x128xf32>
    %37 = arith.mulf %24, %36 : vector<16x128xf32>
    %38 = vector.extract_strided_slice %33 {offsets = [0, 0], sizes = [1, 128], strides = [1, 1]} : vector<2x128xf32> to vector<1x128xf32>
    %39 = vector.broadcast %38 : vector<1x128xf32> to vector<16x128xf32>
    %40 = arith.mulf %37, %39 : vector<16x128xf32>
    %41 = vector.extract_strided_slice %33 {offsets = [1, 0], sizes = [1, 128], strides = [1, 1]} : vector<2x128xf32> to vector<1x128xf32>
    %42 = vector.broadcast %41 : vector<1x128xf32> to vector<16x128xf32>
    %43 = arith.addf %40, %42 : vector<16x128xf32>
    %c0_19 = arith.constant 0 : index
    %c0_20 = arith.constant 0 : index
    %44 = vector.load %arg7[%c0_19, %c0_20] : memref<40x8xbf16, #tpu.memory_space<vmem>>, vector<40x8xbf16>
    %c0_21 = arith.constant 0 : index
    %c0_22 = arith.constant 0 : index
    %45 = vector.load %arg8[%c0_21, %c0_22] : memref<8x32xbf16, #tpu.memory_space<vmem>>, vector<8x32xbf16>
    %c0_23 = arith.constant 0 : index
    %c0_24 = arith.constant 0 : index
    %46 = vector.load %arg9[%c0_23, %c0_24] : memref<56x1xf32, #tpu.memory_space<vmem>>, vector<56x1xf32>
    %47 = vector.extract_strided_slice %46 {offsets = [0, 0], sizes = [40, 1], strides = [1, 1]} : vector<56x1xf32> to vector<40x1xf32>
    %48 = vector.extract_strided_slice %46 {offsets = [40, 0], sizes = [8, 1], strides = [1, 1]} : vector<56x1xf32> to vector<8x1xf32>
    %49 = vector.extract_strided_slice %46 {offsets = [48, 0], sizes = [8, 1], strides = [1, 1]} : vector<56x1xf32> to vector<8x1xf32>
    %50 = vector.extract_strided_slice %43 {offsets = [0, 0], sizes = [8, 128], strides = [1, 1]} : vector<16x128xf32> to vector<8x128xf32>
    %51 = arith.truncf %50 : vector<8x128xf32> to vector<8x128xbf16>
    %cst_25 = arith.constant dense<0.000000e+00> : vector<40x128xf32>
    %52 = tpu.matmul %44, %51, %cst_25 {dimension_numbers = #tpu.dot_dimension_numbers<[1], [0], [0], [1], [0, 0, 1, 1], [], []>} : vector<40x8xbf16>, vector<8x128xbf16>, vector<40x128xf32> -> vector<40x128xf32>
    %53 = vector.broadcast %47 : vector<40x1xf32> to vector<40x128xf32>
    %54 = arith.addf %52, %53 : vector<40x128xf32>
    %55 = vector.extract_strided_slice %54 {offsets = [0, 0], sizes = [32, 128], strides = [1, 1]} : vector<40x128xf32> to vector<32x128xf32>
    %cst_26 = arith.constant 0.000000e+00 : f32
    %56 = vector.broadcast %cst_26 : f32 to vector<32x128xf32>
    %57 = arith.maximumf %55, %56 : vector<32x128xf32>
    %58 = vector.extract_strided_slice %54 {offsets = [32, 0], sizes = [8, 128], strides = [1, 1]} : vector<40x128xf32> to vector<8x128xf32>
    %59 = arith.truncf %57 : vector<32x128xf32> to vector<32x128xbf16>
    %cst_27 = arith.constant dense<0.000000e+00> : vector<8x128xf32>
    %60 = tpu.matmul %45, %59, %cst_27 {dimension_numbers = #tpu.dot_dimension_numbers<[1], [0], [0], [1], [0, 0, 1, 1], [], []>} : vector<8x32xbf16>, vector<32x128xbf16>, vector<8x128xf32> -> vector<8x128xf32>
    %61 = arith.addf %60, %58 : vector<8x128xf32>
    %cst_28 = arith.constant dense<0.000000e+00> : vector<128xf32>
    %62 = vector.multi_reduction <add>, %61, %cst_28 [0] : vector<8x128xf32> to vector<128xf32>
    %63 = vector.shape_cast %62 : vector<128xf32> to vector<1x128xf32>
    %cst_29 = arith.constant 8.000000e+00 : f32
    %64 = vector.broadcast %cst_29 : f32 to vector<1x128xf32>
    %65 = arith.divf %63, %64 : vector<1x128xf32>
    %66 = vector.broadcast %65 : vector<1x128xf32> to vector<8x128xf32>
    %67 = arith.subf %61, %66 : vector<8x128xf32>
    %68 = arith.mulf %67, %67 : vector<8x128xf32>
    %cst_30 = arith.constant dense<0.000000e+00> : vector<128xf32>
    %69 = vector.multi_reduction <add>, %68, %cst_30 [0] : vector<8x128xf32> to vector<128xf32>
    %70 = vector.shape_cast %69 : vector<128xf32> to vector<1x128xf32>
    %cst_31 = arith.constant 8.000000e+00 : f32
    %71 = vector.broadcast %cst_31 : f32 to vector<1x128xf32>
    %72 = arith.divf %70, %71 : vector<1x128xf32>
    %cst_32 = arith.constant 9.99999974E-6 : f32
    %73 = vector.broadcast %cst_32 : f32 to vector<1x128xf32>
    %74 = arith.addf %72, %73 : vector<1x128xf32>
    %75 = math.rsqrt %74 : vector<1x128xf32>
    %76 = vector.broadcast %75 : vector<1x128xf32> to vector<8x128xf32>
    %77 = arith.mulf %67, %76 : vector<8x128xf32>
    %78 = vector.broadcast %48 : vector<8x1xf32> to vector<8x128xf32>
    %79 = arith.mulf %77, %78 : vector<8x128xf32>
    %80 = vector.broadcast %49 : vector<8x1xf32> to vector<8x128xf32>
    %81 = arith.addf %79, %80 : vector<8x128xf32>
    %c0_33 = arith.constant 0 : index
    %c0_34 = arith.constant 0 : index
    %c0_35 = arith.constant 0 : index
    %82 = vector.load %arg10[%c0_33, %c0_34, %c0_35] : memref<2x8x128xf32, #tpu.memory_space<vmem>>, vector<1x8x128xf32>
    %83 = vector.shape_cast %82 : vector<1x8x128xf32> to vector<8x128xf32>
    %84 = vector.shape_cast %81 : vector<8x128xf32> to vector<1x8x128xf32>
    tpu.vector_store %arg10[%c0_33, %c0_34, %c0_35], %84 {strides = array<i32>} : memref<2x8x128xf32, #tpu.memory_space<vmem>>, vector<1x8x128xf32>,
    %85 = vector.extract_strided_slice %43 {offsets = [8, 0], sizes = [8, 128], strides = [1, 1]} : vector<16x128xf32> to vector<8x128xf32>
    %86 = arith.truncf %85 : vector<8x128xf32> to vector<8x128xbf16>
    %cst_36 = arith.constant dense<0.000000e+00> : vector<40x128xf32>
    %87 = tpu.matmul %44, %86, %cst_36 {dimension_numbers = #tpu.dot_dimension_numbers<[1], [0], [0], [1], [0, 0, 1, 1], [], []>} : vector<40x8xbf16>, vector<8x128xbf16>, vector<40x128xf32> -> vector<40x128xf32>
    %88 = vector.broadcast %47 : vector<40x1xf32> to vector<40x128xf32>
    %89 = arith.addf %87, %88 : vector<40x128xf32>
    %90 = vector.extract_strided_slice %89 {offsets = [0, 0], sizes = [32, 128], strides = [1, 1]} : vector<40x128xf32> to vector<32x128xf32>
    %cst_37 = arith.constant 0.000000e+00 : f32
    %91 = vector.broadcast %cst_37 : f32 to vector<32x128xf32>
    %92 = arith.maximumf %90, %91 : vector<32x128xf32>
    %93 = vector.extract_strided_slice %89 {offsets = [32, 0], sizes = [8, 128], strides = [1, 1]} : vector<40x128xf32> to vector<8x128xf32>
    %94 = arith.truncf %92 : vector<32x128xf32> to vector<32x128xbf16>
    %cst_38 = arith.constant dense<0.000000e+00> : vector<8x128xf32>
    %95 = tpu.matmul %45, %94, %cst_38 {dimension_numbers = #tpu.dot_dimension_numbers<[1], [0], [0], [1], [0, 0, 1, 1], [], []>} : vector<8x32xbf16>, vector<32x128xbf16>, vector<8x128xf32> -> vector<8x128xf32>
    %96 = arith.addf %95, %93 : vector<8x128xf32>
    %cst_39 = arith.constant dense<0.000000e+00> : vector<128xf32>
    %97 = vector.multi_reduction <add>, %96, %cst_39 [0] : vector<8x128xf32> to vector<128xf32>
    %98 = vector.shape_cast %97 : vector<128xf32> to vector<1x128xf32>
    %cst_40 = arith.constant 8.000000e+00 : f32
    %99 = vector.broadcast %cst_40 : f32 to vector<1x128xf32>
    %100 = arith.divf %98, %99 : vector<1x128xf32>
    %101 = vector.broadcast %100 : vector<1x128xf32> to vector<8x128xf32>
    %102 = arith.subf %96, %101 : vector<8x128xf32>
    %103 = arith.mulf %102, %102 : vector<8x128xf32>
    %cst_41 = arith.constant dense<0.000000e+00> : vector<128xf32>
    %104 = vector.multi_reduction <add>, %103, %cst_41 [0] : vector<8x128xf32> to vector<128xf32>
    %105 = vector.shape_cast %104 : vector<128xf32> to vector<1x128xf32>
    %cst_42 = arith.constant 8.000000e+00 : f32
    %106 = vector.broadcast %cst_42 : f32 to vector<1x128xf32>
    %107 = arith.divf %105, %106 : vector<1x128xf32>
    %cst_43 = arith.constant 9.99999974E-6 : f32
    %108 = vector.broadcast %cst_43 : f32 to vector<1x128xf32>
    %109 = arith.addf %107, %108 : vector<1x128xf32>
    %110 = math.rsqrt %109 : vector<1x128xf32>
    %111 = vector.broadcast %110 : vector<1x128xf32> to vector<8x128xf32>
    %112 = arith.mulf %102, %111 : vector<8x128xf32>
    %113 = vector.broadcast %48 : vector<8x1xf32> to vector<8x128xf32>
    %114 = arith.mulf %112, %113 : vector<8x128xf32>
    %115 = vector.broadcast %49 : vector<8x1xf32> to vector<8x128xf32>
    %116 = arith.addf %114, %115 : vector<8x128xf32>
    %c1 = arith.constant 1 : index
    %c0_44 = arith.constant 0 : index
    %c0_45 = arith.constant 0 : index
    %117 = vector.load %arg10[%c1, %c0_44, %c0_45] : memref<2x8x128xf32, #tpu.memory_space<vmem>>, vector<1x8x128xf32>
    %118 = vector.shape_cast %117 : vector<1x8x128xf32> to vector<8x128xf32>
    %119 = vector.shape_cast %116 : vector<8x128xf32> to vector<1x8x128xf32>
    tpu.vector_store %arg10[%c1, %c0_44, %c0_45], %119 {strides = array<i32>} : memref<2x8x128xf32, #tpu.memory_space<vmem>>, vector<1x8x128xf32>,
    return
  }
  func.func @transform_0(%arg0: i32) -> (i32, i32, i32) {
    %c0_i32 = arith.constant 0 : i32
    %c0_i32_0 = arith.constant 0 : i32
    %c0_i32_1 = arith.constant 0 : i32
    return %arg0, %c0_i32, %c0_i32_0 : i32, i32, i32
  }
  func.func @transform_1(%arg0: i32) -> (i32, i32) {
    %c0_i32 = arith.constant 0 : i32
    %c0_i32_0 = arith.constant 0 : i32
    %c0_i32_1 = arith.constant 0 : i32
    return %c0_i32, %c0_i32_0 : i32, i32
  }
  func.func @transform_2(%arg0: i32) -> (i32, i32) {
    %c0_i32 = arith.constant 0 : i32
    %c0_i32_0 = arith.constant 0 : i32
    %c0_i32_1 = arith.constant 0 : i32
    return %c0_i32, %c0_i32_0 : i32, i32
  }
  func.func @transform_3(%arg0: i32) -> (i32, i32) {
    %c0_i32 = arith.constant 0 : i32
    %c0_i32_0 = arith.constant 0 : i32
    %c0_i32_1 = arith.constant 0 : i32
    return %c0_i32, %c0_i32_0 : i32, i32
  }
  func.func @transform_4(%arg0: i32) -> (i32, i32) {
    %c0_i32 = arith.constant 0 : i32
    %c0_i32_0 = arith.constant 0 : i32
    %c0_i32_1 = arith.constant 0 : i32
    return %c0_i32, %c0_i32_0 : i32, i32
  }
  func.func @transform_5(%arg0: i32) -> (i32, i32) {
    %c0_i32 = arith.constant 0 : i32
    %c0_i32_0 = arith.constant 0 : i32
    %c0_i32_1 = arith.constant 0 : i32
    return %c0_i32, %c0_i32_0 : i32, i32
  }
  func.func @transform_6(%arg0: i32) -> (i32, i32) {
    %c0_i32 = arith.constant 0 : i32
    %c0_i32_0 = arith.constant 0 : i32
    %c0_i32_1 = arith.constant 0 : i32
    return %c0_i32, %c0_i32_0 : i32, i32
  }
  func.func @transform_7(%arg0: i32) -> (i32, i32) {
    %c0_i32 = arith.constant 0 : i32
    %c0_i32_0 = arith.constant 0 : i32
    %c0_i32_1 = arith.constant 0 : i32
    return %c0_i32, %c0_i32_0 : i32, i32
  }
  func.func @transform_8(%arg0: i32) -> (i32, i32) {
    %c0_i32 = arith.constant 0 : i32
    %c0_i32_0 = arith.constant 0 : i32
    %c0_i32_1 = arith.constant 0 : i32
    return %c0_i32, %c0_i32_0 : i32, i32
  }
  func.func @transform_9(%arg0: i32) -> (i32, i32, i32) {
    %c0_i32 = arith.constant 0 : i32
    %c0_i32_0 = arith.constant 0 : i32
    %c0_i32_1 = arith.constant 0 : i32
    return %arg0, %c0_i32, %c0_i32_0 : i32, i32, i32
  }
}

</mosaic_0001>

<bundles_post_ra>
// kernel: residual_3d_block.1
= control target key start
LH: loop header
LB: loop body
LE: loop exit
PB: predicated region body
PF: predicated region fallthrough
CT: control target
= control target key end

     0   :  { %14 = vsyncpa [#allocation3], 0  ;;  %s2454_s0 = inlined_call_operand.vmem [shape: f32[4,8,128], index: 0, kind: input, shape index: {}]   ;;  %s2455_s1 = inlined_call_operand.vmem [shape: bf16[128,384], index: 1, kind: input, shape index: {}]   ;;  %s2456_s2 = inlined_call_operand.hbm [shape: f32[1,384], index: 2, kind: input, shape index: {}]   ;;  %s2457_s3 = inlined_call_operand.vmem [shape: bf16[256,128], index: 3, kind: input, shape index: {}]   ;;  %s2458_s4 = inlined_call_operand.vmem [shape: bf16[128,128], index: 4, kind: input, shape index: {}]   ;;  %s2459_s5 = inlined_call_operand.hbm [shape: f32[2,128], index: 5, kind: input, shape index: {}]   ;;  %s2460_s6 = inlined_call_operand.vmem [shape: bf16[40,8], index: 6, kind: input, shape index: {}]   ;;  %s2461_s7 = inlined_call_operand.vmem [shape: bf16[8,32], index: 7, kind: input, shape index: {}]   ;;  %s2462_s8 = inlined_call_operand.vmem [shape: f32[56,1], index: 8, kind: input, shape index: {}]   ;;  %s2463_s9 = inlined_call_operand.vmem [shape: f32[4,8,128], index: 9, kind: output, shape index: {}]  }
   0x1   :  { %15 = vsyncpa [#allocation5], 0  ;;  %s2018_s30 = smov 0  }
   0x2 LB: > { %s1477_s10 = sadd.s32 4294967295, %s1961_s30   ;;  %p1479_p0 = scmp.ge.s32.totalorder %s1961_s30, 1  ;;  %s1961_s30 = sphi %s2018_s30, %s21_s30  }
   0x3   : > { %p246_p1 = scmp.lt.s32.totalorder %s1961_s30, 3  ;;  %p2028_p2 = scmp.eq.s32.totalorder %s1477_s10, 0 }
   0x4   : > { %s1963_s13 = smov [#allocation2]   ;;  %s1964_s15 = smov [#allocation4]  }
   0x5   : > { %s2467_s11 = scalar_select %p2028_p2, 1, 0 }
   0x6   : > { %p2032_p3 = pnand %p1479_p0, %p246_p1  ;;  %s262_s14 = sshll.u32 %s1963_s13, 4  ;;  %s263_s14 = int_to_ptr.vmem [resolvable:$true] %s262_s14 }
   0x7   : > { %s279_s16 = sshll.u32 %s1964_s15, 4  ;;  %s1891_s20 = scalar_lea.hbm %s2456_s2, 48  ;;  %s2044_s16 = int_to_ptr.vmem [resolvable:$true] %s279_s16 }
   0x8   : > { %s2468_s12 = scalar_select %p2032_p3, 1, 0 }
   0x9   : > { %p1798_p4 = pneg %p2032_p3  ;;  %p1892_p6 = scmp.ne.s32.totalorder %s2456_s2, %s1891_s20 }
   0xa   : > { %p1898_p10 = scmp.lt.u32.totalorder %s1891_s20, %s2456_s2 }
   0xb   : > { %p2040_p5 = pnand %p2028_p2, %p1798_p4 }
   0xd   : > { %p1893_p7 = pneg %p2040_p5 }
   0xf   : > { %p1894_p8 = pnand %p1893_p7, %p1892_p6 }
  0x11   : > { %p1895_p9 = pneg %p1894_p8 }
  0x13   : > { %p1900_p11 = pnand %p1898_p10, %p1895_p9 }
  0x15   : > { %1903 = shalt.err (!%p1900_p11)
}
  0x16   : > { %s1904_s25 = scalar_lea.vmem %s263_s14, 48  ;;  %s1911_s26 = scalar_lea.vmem %s263_s14, 64 }
  0x17   : > { %p1905_p12 = scmp.ne.s32.totalorder %s263_s14, %s1904_s25  ;;  %p1912_p1 = scmp.lt.s32.totalorder %s263_s14, %s263_s14 }
  0x18   : > { %p1913_p4 = scmp.lt.s32.totalorder %s1911_s26, %s1904_s25 }
  0x19   : > { %p1907_p13 = pnand %p1905_p12, %p1893_p7 }
  0x1a   : > { %p1914_p2 = por %p1913_p4, %p1912_p1 }
  0x1b   : > { %p1908_p0 = pneg %p1907_p13 }
  0x1d   : > { %p1915_p3 = pnand %p1914_p2, %p1908_p0 }
  0x1f   : > { %1918 = shalt.err (!%p1915_p3)
}
  0x20   : > { %1801 = dma.hbm_to_vmem [thread:$0]  (!%p2040_p5), %s2456_s2, 48, %s263_s14, [#allocation3]  }
  0x21   : > { %s1919_s15 = scalar_lea.hbm %s2459_s5, 32 }
  0x22   : > { %p1920_p6 = scmp.ne.s32.totalorder %s2459_s5, %s1919_s15  ;;  %p1926_p3 = scmp.lt.u32.totalorder %s1919_s15, %s2459_s5 }
  0x24   : > { %p1922_p8 = pnand %p1920_p6, %p1893_p7 }
  0x26   : > { %p1923_p2 = pneg %p1922_p8 }
  0x28   : > { %p1928_p9 = pnand %p1926_p3, %p1923_p2 }
  0x2a   : > { %1931 = shalt.err (!%p1928_p9)
}
  0x2b   : > { %s1932_s14 = scalar_lea.vmem %s2044_s16, 32  ;;  %p1940_p13 = scmp.lt.s32.totalorder %s2044_s16, %s2044_s16 }
  0x2c   : > { %p1933_p10 = scmp.ne.s32.totalorder %s2044_s16, %s1932_s14  ;;  %p1941_p0 = scmp.lt.s32.totalorder %s1932_s14, %s1932_s14 }
  0x2e   : > { %p1935_p11 = pnand %p1933_p10, %p1893_p7  ;;  %p1942_p1 = por %p1941_p0, %p1940_p13 }
  0x30   : > { %p1936_p12 = pneg %p1935_p11 }
  0x32   : > { %p1943_p4 = pnand %p1942_p1, %p1936_p12 }
  0x34   : > { %1946 = shalt.err (!%p1943_p4)
}
  0x35   : > { %1804 = dma.hbm_to_vmem [thread:$0]  (!%p2040_p5), %s2459_s5, 32, %s2044_s16, [#allocation5]  }
  0x36   : > { %p2470_p6 = scmp.ne.s32.totalorder %s2468_s12, 0 }
  0x37   : > { %p2471_p8 = scmp.ne.s32.totalorder (!%p2470_p6), %s2467_s11, 0 }
  0x38   : > { %310 = sbr.rel (%p2470_p6) target bundleno = 1807 (0x70f), region = 56 }
  0x3f   : > { %1952 = dma.done.wait (%p2471_p8), [#allocation3], 48  }
  0x40   : > { %1954 = vsyncadd (%p2471_p8), [#allocation3], 4294967248 }
  0x41   : > { %1956 = dma.done.wait (%p2471_p8), [#allocation5], 32  }
  0x42   : > { %1958 = vsyncadd (%p2471_p8), [#allocation5], 4294967264  ;;  %v1965_v0 = vmov 0   ;;  %v1966_v1 = vmov 0.0   ;;  %v1824_v2 = vld [vmem:[%s2455_s1 + $0x4] ss:$12 sps:$4 sm:$0xff]   ;;  %v400_v49 = vlaneseq }
  0x43   : > { %575 = vmatprep.mubr.bf16.mxu0 %v1965_v0  ;;  %1633 = vmatprep.subr.bf16.mxu1 %v1966_v1  ;;  %v1826_v3 = vld [vmem:[%s2455_s1] ss:$12 sps:$4 sm:$0xff]   ;;  %v1827_v4 = vld [vmem:[%s2455_s1 + $0x1c] ss:$12 sps:$4 sm:$0xff]   ;;  %v1829_v5 = vld [vmem:[%s2455_s1 + $0x18] ss:$12 sps:$4 sm:$0xff]  }
  0x44   : > { %1822 = vset.pattern.permute.xlu0 %v1965_v0  ;;  %1823 = vset.pattern.permute.xlu1 %v1965_v0  ;;  %v1830_v6 = vld [vmem:[%s2455_s1 + $0x34] ss:$12 sps:$4 sm:$0xff]   ;;  %s1486_s13 = sshll.u32 %s1477_s10, 1  ;;  %v1832_v7 = vld [vmem:[%s2455_s1 + $0x30] ss:$12 sps:$4 sm:$0xff]   ;;  %v1852_v29 = vld [vmem:[%s2457_s3 + $0x48] sm:$0xff]  }
  0x45   : > { %543 = vmatprep.subr.bf16.mxu0 %v1824_v2  ;;  %v1833_v8 = vld [vmem:[%s2455_s1 + $0x4c] ss:$12 sps:$4 sm:$0xff]   ;;  %p351_p5 = scmp.lt.s32.totalorder %s1486_s13, 3  ;;  %v1835_v9 = vld [vmem:[%s2455_s1 + $0x48] ss:$12 sps:$4 sm:$0xff]   ;;  %v1849_v25 = vld [vmem:[%s2457_s3 + $0x40] sm:$0xff]  }
  0x46   : > { %544 = vmatpush1.bf16.msra.mxu0 %v1826_v3  ;;  %v1836_v10 = vld [vmem:[%s2455_s1 + $0x64] ss:$12 sps:$4 sm:$0xff]   ;;  %v1848_v11 = vld [vmem:[%s2455_s1 + $0x8] ss:$12 sps:$4 sm:$0xff]   ;;  %v1838_v12 = vld [vmem:[%s2455_s1 + $0x60] ss:$12 sps:$4 sm:$0xff]  }
  0x47   : > { %545 = vmatprep.subr.bf16.mxu0 %v1827_v4  ;;  %s2473_s13 = smov (!%p351_p5, %s1486_s13), 3  ;;  %1634 = vmatpush3.bf16.msra.mxu1 %v1848_v11  ;;  %v1851_v13 = vld [vmem:[%s2455_s1 + $0x20] ss:$12 sps:$4 sm:$0xff]   ;;  %v1839_v14 = vld [vmem:[%s2455_s1 + $0x7c] ss:$12 sps:$4 sm:$0xff]   ;;  %v1855_v31 = vld [vmem:[%s2457_s3 + $0x50] sm:$0xff]  }
  0x48   : > { %1635 = vmatprep.subr.bf16.mxu1 %v1966_v1  ;;  %s1487_s27 = sshll.u32 %s2473_s13, 3  ;;  %v1854_v15 = vld [vmem:[%s2455_s1 + $0x38] ss:$12 sps:$4 sm:$0xff]   ;;  %v1842_v17 = vld [vmem:[%s2455_s1 + $0x94] ss:$12 sps:$4 sm:$0xff]   ;;  %v1853_v30 = vld [vmem:[%s2457_s3 + $0x8] sm:$0xff]  }
  0x49   : > { %v1841_v16 = vld [vmem:[%s2455_s1 + $0x78] ss:$12 sps:$4 sm:$0xff]   ;;  %s354_s22 = scalar_lea.vmem %s2454_s0, %s1487_s27  ;;  %v1857_v18 = vld [vmem:[%s2455_s1 + $0x50] ss:$12 sps:$4 sm:$0xff]   ;;  %v1847_v21 = vld [vmem:[%s2455_s1 + $0xa8] ss:$12 sps:$4 sm:$0xff]   ;;  %s2447_s14 = scalar_lea.vmem %s2463_s9, %s1487_s27 }
  0x4a   : > { %546 = vmatpush1.bf16.msra.mxu0 %v1829_v5  ;;  %v1844_v19 = vld [vmem:[%s2455_s1 + $0x90] ss:$12 sps:$4 sm:$0xff]   ;;  %v1845_v20 = vld [vmem:[%s2455_s1 + $0xac] ss:$12 sps:$4 sm:$0xff]   ;;  %v363_v22 = vld [vmem:[%s354_s22] sm:$0xff]  ;;  %vm1967_vm0 = vmmov 0  }
  0x4b   : > { %547 = vmatprep.subr.bf16.mxu0 %v1830_v6  ;;  %1636 = vmatpush3.bf16.msra.mxu1 %v1851_v13  ;;  %v1860_v23 = vld [vmem:[%s2455_s1 + $0x68] ss:$12 sps:$4 sm:$0xff]   ;;  %v1863_v26 = vld [vmem:[%s2455_s1 + $0x80] ss:$12 sps:$4 sm:$0xff]   ;;  %v1858_v33 = vld [vmem:[%s2457_s3 + $0x58] sm:$0xff]   ;;  %v2275_v50 = vshrl.u32 %v400_v49, 7 }
  0x4c   : > { %1637 = vmatprep.subr.bf16.mxu1 %v1966_v1  ;;  %v364_v24 = vld [vmem:[%s354_s22 + $0x8] sm:$0xff]  ;;  %v1850_v27 = vld [vmem:[%s2457_s3] sm:$0xff]   ;;  %v1856_v32 = vld [vmem:[%s2457_s3 + $0x10] sm:$0xff]   ;;  %1649 = vmatprep.mubr.msk.bf16.mxu1 %vm1967_vm0, %v1966_v1  ;;  %vm1127_vm1 = vcmask 1043456   ;;  %vm1117_vm2 = vcmask 64512   ;;  %vm1193_vm3 = vcmask 261120  }
  0x4d   : > { %v365_v28 = vpack.c.bf16 %v364_v24, %v363_v22  ;;  %v1859_v34 = vld [vmem:[%s2457_s3 + $0x18] sm:$0xff]   ;;  %v1861_v35 = vld [vmem:[%s2457_s3 + $0x60] sm:$0xff]   ;;  %v1864_v37 = vld [vmem:[%s2457_s3 + $0x68] sm:$0xff]   ;;  %v402_v51 = vsub.s32 0, %v2275_v50  ;;  %v406_v53 = vsub.s32 1, %v2275_v50 }
  0x4e   : > { %548 = vmatpush1.bf16.msra.mxu0 %v1832_v7  ;;  %v1862_v36 = vld [vmem:[%s2457_s3 + $0x20] sm:$0xff]   ;;  %v1865_v38 = vld [vmem:[%s2457_s3 + $0x28] sm:$0xff]   ;;  %v1867_v40 = vld [vmem:[%s2457_s3 + $0x70] sm:$0xff]  }
  0x4f   : > { %549 = vmatprep.subr.bf16.mxu0 %v1833_v8  ;;  %1638 = vmatpush3.bf16.msra.mxu1 %v1854_v15  ;;  %v1866_v39 = vld [vmem:[%s2455_s1 + $0x98] ss:$12 sps:$4 sm:$0xff]   ;;  %v1868_v41 = vld [vmem:[%s2457_s3 + $0x30] sm:$0xff]   ;;  %v2256_v46 = vld [vmem:[%s2458_s4 + $0x8] sm:$0xff]   ;;  %v410_v15 = vsub.s32 2, %v2275_v50 }
  0x50   : > { %1639 = vmatprep.subr.bf16.mxu1 %v1966_v1  ;;  %v1869_v42 = vld [vmem:[%s2455_s1 + $0xb0] ss:$12 sps:$4 sm:$0xff]   ;;  %v2250_v45 = vld [vmem:[%s2458_s4] sm:$0xff]  }
  0x51   : > { %v1870_v43 = vld [vmem:[%s2457_s3 + $0x78] sm:$0xff]   ;;  %v2263_v47 = vld [vmem:[%s2458_s4 + $0x10] sm:$0xff]   ;;  %v398_v52 = vld [vmem:[#allocation2] sm:$0x7] }
  0x52   : > { %550 = vmatpush1.bf16.msra.mxu0 %v1835_v9  ;;  %v1871_v44 = vld [vmem:[%s2457_s3 + $0x38] sm:$0xff]   ;;  %v403_v54 = vrot.slane %v398_v52, %v402_v51  ;;  %v407_v55 = vrot.slane %v398_v52, %v406_v53  ;;  %v2296_v8 = vld [vmem:[%s2458_s4 + $0x20] sm:$0xff]   ;;  %v2314_v13 = vld [vmem:[%s2458_s4 + $0x30] sm:$0xff]  }
  0x53   : > { %551 = vmatprep.subr.bf16.mxu0 %v1836_v10  ;;  %1640 = vmatpush3.bf16.msra.mxu1 %v1857_v18  ;;  %v2270_v48 = vld [vmem:[%s2458_s4 + $0x18] sm:$0xff]  }
  0x54   : > { %1641 = vmatprep.subr.bf16.mxu1 %v1966_v1 }
  0x56   : > { %552 = vmatpush1.bf16.msra.mxu0 %v1838_v12  ;;  %v2305_v12 = vld [vmem:[%s2458_s4 + $0x28] sm:$0xff]  }
  0x57   : > { %553 = vmatprep.subr.bf16.mxu0 %v1839_v14  ;;  %1642 = vmatpush3.bf16.msra.mxu1 %v1860_v23  ;;  %v2323_v14 = vld [vmem:[%s2458_s4 + $0x38] sm:$0xff]  }
  0x58   : > { %1643 = vmatprep.subr.bf16.mxu1 %v1966_v1 }
  0x5a   : > { %554 = vmatpush1.bf16.msra.mxu0 %v1841_v16  ;;  %v411_v16 = vrot.slane %v398_v52, %v410_v15 }
  0x5b   : > { %555 = vmatprep.subr.bf16.mxu0 %v1842_v17  ;;  %1644 = vmatpush3.bf16.msra.mxu1 %v1863_v26 }
  0x5c   : > { %1645 = vmatprep.subr.bf16.mxu1 %v1966_v1 }
  0x5e   : > { %556 = vmatpush1.bf16.msra.mxu0 %v1844_v19 }
  0x5f   : > { %557 = vmatprep.subr.bf16.mxu0 %v1845_v20  ;;  %1646 = vmatpush3.bf16.msra.mxu1 %v1866_v39 }
  0x60   : > { %1647 = vmatprep.subr.bf16.mxu1 %v1966_v1 }
  0x62   : > { %558 = vmatpush1.bf16.msra.mxu0 %v1847_v21 }
  0x63   : > { %1561 = vmatprep.subr.bf16.mxu0 %v1849_v25  ;;  %1648 = vmatpush3.bf16.msra.mxu1 %v1869_v42 }
  0x64   : > { %1653 = vmatprep.subr.bf16.mxu1 %v1966_v1 }
  0x65   : > { %576 = vmatmul.mubr.bf16.vlgmr.msra.gmra.mrb[0].mxu0 %v365_v28 }
  0x66   : > { %1562 = vmatpush3.bf16.msra.mxu0 %v1850_v27  ;;  %1650 = vmatmul.mubr.bf16.vlgmr.msra.gmra.mrb[0].mxu1 %v365_v28 }
  0x67   : > { %1563 = vmatprep.subr.bf16.mxu0 %v1852_v29  ;;  %1669 = vmatprep.mubr.msk.bf16.mxu1 %vm1967_vm0, %v1966_v1 }
  0x68   : > { %1654 = vmatpush3.bf16.msra.mxu1 %v2250_v45 }
  0x69   : > { %1655 = vmatprep.subr.bf16.mxu1 %v1966_v1 }
  0x6a   : > { %1564 = vmatpush3.bf16.msra.mxu0 %v1853_v30 }
  0x6b   : > { %1565 = vmatprep.subr.bf16.mxu0 %v1855_v31 }
  0x6c   : > { %1656 = vmatpush3.bf16.msra.mxu1 %v2256_v46 }
  0x6d   : > { %1657 = vmatprep.subr.bf16.mxu1 %v1966_v1 }
  0x6e   : > { %1566 = vmatpush3.bf16.msra.mxu0 %v1856_v32 }
  0x6f   : > { %1567 = vmatprep.subr.bf16.mxu0 %v1858_v33 }
  0x70   : > { %1658 = vmatpush3.bf16.msra.mxu1 %v2263_v47 }
  0x71   : > { %1659 = vmatprep.subr.bf16.mxu1 %v1966_v1 }
  0x72   : > { %1568 = vmatpush3.bf16.msra.mxu0 %v1859_v34 }
  0x73   : > { %1569 = vmatprep.subr.bf16.mxu0 %v1861_v35 }
  0x74   : > { %1660 = vmatpush3.bf16.msra.mxu1 %v2270_v48 }
  0x75   : > { %1661 = vmatprep.subr.bf16.mxu1 %v1966_v1 }
  0x76   : > { %1570 = vmatpush3.bf16.msra.mxu0 %v1862_v36 }
  0x77   : > { %1571 = vmatprep.subr.bf16.mxu0 %v1864_v37 }
  0x78   : > { %1662 = vmatpush3.bf16.msra.mxu1 %v2296_v8 }
  0x79   : > { %1663 = vmatprep.subr.bf16.mxu1 %v1966_v1 }
  0x7a   : > { %1572 = vmatpush3.bf16.msra.mxu0 %v1865_v38 }
  0x7b   : > { %1573 = vmatprep.subr.bf16.mxu0 %v1867_v40 }
  0x7c   : > { %1664 = vmatpush3.bf16.msra.mxu1 %v2305_v12 }
  0x7d   : > { %1665 = vmatprep.subr.bf16.mxu1 %v1966_v1 }
  0x7e   : > { %1574 = vmatpush3.bf16.msra.mxu0 %v1868_v41 }
  0x7f   : > { %1575 = vmatprep.subr.bf16.mxu0 %v1870_v43 }
  0x80   : > { %1666 = vmatpush3.bf16.msra.mxu1 %v2314_v13 }
  0x81   : > { %1667 = vmatprep.subr.bf16.mxu1 %v1966_v1 }
  0x82   : > { %1576 = vmatpush3.bf16.msra.mxu0 %v1871_v44 }
  0x83   : > { %1693 = vmatprep.subr.bf16.mxu0 %v1966_v1 }
  0x84   : > { %1668 = vmatpush3.bf16.msra.mxu1 %v2323_v14 }
  0x85   : > { %1673 = vmatprep.subr.bf16.mxu1 %v1966_v1 }
 0x138   : > { %v577_v56 = vpop.f32.mrb[0].mxu0 }
 0x139   : > { %v578_v57 = vadd.f32 %v577_v56, %v403_v54  ;;  %v579_v58 = vpop.f32.mrb[1].mxu0  ;;  %v620_v7 = vpop.f32.mrb[0].mxu1  ;;  %v1077_v56 = vld [vmem:[%s2462_s8 + $0x30] sm:$0xff] }
 0x13a   : > { %v580_v59 = vadd.f32 %v579_v58, %v407_v55  ;;  %v581_v60 = vpop.f32.mrb[2].mxu0  ;;  %v1651_v9 = vpop.f32.mrb[1].mxu1  ;;  %v621_v17 = vadd.f32 %v620_v7, %v411_v16 }
 0x13b   : > { %v582_v61 = vadd.f32 %v581_v60, %v403_v54  ;;  %v583_v62 = vpop.f32.mrb[3].mxu0  ;;  %v627_v0 = vmax.f32 %v578_v57, 0.0  ;;  %v623_v10 = vpop.f32.mrb[2].mxu1  ;;  %v1075_v54 = vld [vmem:[%s2462_s8 + $0x20] sm:$0xff] }
 0x13c   : > { %v584_v63 = vadd.f32 %v583_v62, %v407_v55  ;;  %v628_v3 = vmax.f32 %v580_v59, 0.0  ;;  %v1652_v11 = vpop.f32.mrb[3].mxu1  ;;  %v624_v23 = vadd.f32 %v623_v10, %v411_v16  ;;  %v1076_v55 = vld [vmem:[%s2462_s8 + $0x28] sm:$0xff] }
 0x13d   : > { %v629_v2 = vmax.f32 %v582_v61, 0.0 }
 0x13e   : > { %v630_v4 = vmax.f32 %v584_v63, 0.0 }
 0x13f   : > { %v631_v5 = vpack.c.bf16 %v629_v2, %v627_v0 }
 0x140   : > { %v632_v6 = vpack.c.bf16 %v630_v4, %v628_v3 }
 0x142   : > { %793 = vmatprep.mubr.bf16.mxu0 %v632_v6  ;;  %v1046_v6 = vld [vmem:[#allocation4] sm:$0x3] }
 0x143   : > { %794 = vmatmul.mubr.bf16.vlgmr.msra.gmra.mrb[4].mxu0 %v631_v5  ;;  %v1056_v7 = vrot.slane %v1046_v6, %v402_v51  ;;  %v1062_v9 = vrot.slane %v1046_v6, %v406_v53  ;;  %v1880_v51 = vld [vmem:[%s2460_s6] sm:$0xff]   ;;  %v1881_v53 = vld [vmem:[%s2460_s6 + $0x8] sm:$0xff]  }
 0x144   : > { %1694 = vmatpush3.bf16.msra.mxu0 %v2250_v45  ;;  %1709 = vmatprep.mubr.msk.bf16.mxu0 %vm1967_vm0, %v1966_v1 }
 0x145   : > { %1695 = vmatprep.subr.bf16.mxu0 %v1966_v1 }
 0x148   : > { %1696 = vmatpush3.bf16.msra.mxu0 %v2256_v46 }
 0x149   : > { %1697 = vmatprep.subr.bf16.mxu0 %v1966_v1 }
 0x14c   : > { %1698 = vmatpush3.bf16.msra.mxu0 %v2263_v47 }
 0x14d   : > { %1699 = vmatprep.subr.bf16.mxu0 %v1966_v1 }
 0x150   : > { %1700 = vmatpush3.bf16.msra.mxu0 %v2270_v48 }
 0x151   : > { %1701 = vmatprep.subr.bf16.mxu0 %v1966_v1 }
 0x154   : > { %1702 = vmatpush3.bf16.msra.mxu0 %v2296_v8 }
 0x155   : > { %1703 = vmatprep.subr.bf16.mxu0 %v1966_v1 }
 0x158   : > { %1704 = vmatpush3.bf16.msra.mxu0 %v2305_v12 }
 0x159   : > { %1705 = vmatprep.subr.bf16.mxu0 %v1966_v1 }
 0x15c   : > { %1706 = vmatpush3.bf16.msra.mxu0 %v2314_v13 }
 0x15d   : > { %1707 = vmatprep.subr.bf16.mxu0 %v1966_v1 }
 0x160   : > { %1708 = vmatpush3.bf16.msra.mxu0 %v2323_v14 }
 0x161   : > { %1713 = vmatprep.subr.bf16.mxu0 %v1966_v1 }
 0x216   : > { %v1577_v18 = vpop.f32.mrb[4].mxu0 }
 0x217   : > { %v1578_v19 = vpop.f32.mrb[5].mxu0 }
 0x218   : > { %v1579_v20 = vadd.f32 %v1578_v19, %v1577_v18  ;;  %v1580_v21 = vpop.f32.mrb[6].mxu0 }
 0x219   : > { %v1581_v22 = vpop.f32.mrb[7].mxu0 }
 0x21a   : > { %v796_v24 = vadd.f32 %v1579_v20, %v621_v17  ;;  %v1582_v25 = vadd.f32 %v1581_v22, %v1580_v21  ;;  %v1882_v20 = vld [vmem:[%s2460_s6 + $0x10] ss:$0 sps:$4 sm:$0xff]  }
 0x21c   : > { %v799_v26 = vadd.f32 %v1582_v25, %v624_v23 }
 0x21e   : > { %v818_v27 = vpack.c.bf16 %v799_v26, %v796_v24 }
 0x220   : > { %v820_v28 = vunpack.c.h.bf16 %v818_v27  ;;  %v819_v29 = vunpack.c.l.bf16 %v818_v27 }
 0x222   : > { %v822_v30 = vsub.f32 %v799_v26, %v820_v28  ;;  %v821_v31 = vsub.f32 %v796_v24, %v819_v29 }
 0x224   : > { %v823_v32 = vpack.c.bf16 %v822_v30, %v821_v31 }
 0x226   : > { %1670 = vmatmul.mubr.bf16.vlgmr.msra.gmra.mrb[4].mxu1 %v823_v32 }
 0x227   : > { %1674 = vmatpush3.bf16.msra.mxu1 %v2250_v45  ;;  %1689 = vmatprep.mubr.msk.bf16.mxu1 %vm1967_vm0, %v1966_v1 }
 0x228   : > { %1675 = vmatprep.subr.bf16.mxu1 %v1966_v1 }
 0x22b   : > { %1676 = vmatpush3.bf16.msra.mxu1 %v2256_v46 }
 0x22c   : > { %1677 = vmatprep.subr.bf16.mxu1 %v1966_v1 }
 0x22f   : > { %1678 = vmatpush3.bf16.msra.mxu1 %v2263_v47 }
 0x230   : > { %1679 = vmatprep.subr.bf16.mxu1 %v1966_v1 }
 0x233   : > { %1680 = vmatpush3.bf16.msra.mxu1 %v2270_v48 }
 0x234   : > { %1681 = vmatprep.subr.bf16.mxu1 %v1966_v1 }
 0x237   : > { %1682 = vmatpush3.bf16.msra.mxu1 %v2296_v8 }
 0x238   : > { %1683 = vmatprep.subr.bf16.mxu1 %v1966_v1 }
 0x23b   : > { %1684 = vmatpush3.bf16.msra.mxu1 %v2305_v12 }
 0x23c   : > { %1685 = vmatprep.subr.bf16.mxu1 %v1966_v1 }
 0x23f   : > { %1686 = vmatpush3.bf16.msra.mxu1 %v2314_v13 }
 0x240   : > { %1687 = vmatprep.subr.bf16.mxu1 %v1966_v1 }
 0x243   : > { %1688 = vmatpush3.bf16.msra.mxu1 %v2323_v14 }
 0x244   : > { %1733 = vmatprep.subr.bf16.mxu1 %v1966_v1 }
 0x246   : > { %1690 = vmatmul.mubr.bf16.vlgmr.msra.gmra.mrb[4].mxu1 %v818_v27 }
 0x247   : > { %1735 = vmatprep.mubr.msk.bf16.mxu1 %vm1967_vm0, %v1966_v1 }
 0x319   : > { %v947_v33 = vpop.f32.mrb[4].mxu1 }
 0x31a   : > { %v2350_v34 = vsub.f32 %v796_v24, %v947_v33  ;;  %v1691_v35 = vpop.f32.mrb[5].mxu1 }
 0x31b   : > { %v950_v36 = vpop.f32.mrb[6].mxu1 }
 0x31c   : > { %v2352_v37 = vsub.f32 %v799_v26, %v950_v36  ;;  %v1692_v38 = vpop.f32.mrb[7].mxu1  ;;  %v956_v39 = vmul.f32 %v2350_v34, %v2350_v34 }
 0x31e   : > { %v957_v40 = vmul.f32 %v2352_v37, %v2352_v37 }
 0x320   : > { %v958_v41 = vpack.c.bf16 %v957_v40, %v956_v39 }
 0x322   : > { %v959_v42 = vunpack.c.l.bf16 %v958_v41  ;;  %v960_v43 = vunpack.c.h.bf16 %v958_v41 }
 0x324   : > { %v961_v44 = vsub.f32 %v956_v39, %v959_v42  ;;  %v962_v49 = vsub.f32 %v957_v40, %v960_v43 }
 0x326   : > { %v963_v52 = vpack.c.bf16 %v962_v49, %v961_v44 }
 0x328   : > { %1710 = vmatmul.mubr.bf16.vlgmr.msra.gmra.mrb[8].mxu0 %v963_v52 }
 0x329   : > { %1714 = vmatpush3.bf16.msra.mxu0 %v2250_v45  ;;  %1729 = vmatprep.mubr.msk.bf16.mxu0 %vm1967_vm0, %v1966_v1  ;;  %v1071_v45 = vld [vmem:[%s2462_s8] sm:$0xff] }
 0x32a   : > { %1715 = vmatprep.subr.bf16.mxu0 %v1966_v1  ;;  %1081 = vperm.xlu0 %1822, %v1071_v45  }
 0x32d   : > { %1716 = vmatpush3.bf16.msra.mxu0 %v2256_v46  ;;  %v1073_v46 = vld [vmem:[%s2462_s8 + $0x10] sm:$0xff] }
 0x32e   : > { %1717 = vmatprep.subr.bf16.mxu0 %v1966_v1  ;;  %1091 = vperm.xlu1 %1823, %v1073_v46  }
 0x331   : > { %1718 = vmatpush3.bf16.msra.mxu0 %v2263_v47  ;;  %v1072_v47 = vld [vmem:[%s2462_s8 + $0x8] sm:$0xff] }
 0x332   : > { %1719 = vmatprep.subr.bf16.mxu0 %v1966_v1  ;;  %1086 = vperm.xlu0 %1822, %v1072_v47  }
 0x335   : > { %1720 = vmatpush3.bf16.msra.mxu0 %v2270_v48  ;;  %v1074_v48 = vld [vmem:[%s2462_s8 + $0x18] sm:$0xff] }
 0x336   : > { %1721 = vmatprep.subr.bf16.mxu0 %v1966_v1  ;;  %1096 = vperm.xlu1 %1823, %v1074_v48  }
 0x337   : > { %1101 = vperm.xlu0 %1822, %v1075_v54  }
 0x339   : > { %1722 = vmatpush3.bf16.msra.mxu0 %v2296_v8 }
 0x33a   : > { %1723 = vmatprep.subr.bf16.mxu0 %v1966_v1  ;;  %1259 = vperm.xlu1 %1823, %v1076_v55   ;;  %v1070_v55 = vld [vmem:[%s2461_s7] sm:$0xf] }
 0x33b   : > { %1265 = vperm.xlu0 %1822, %v1077_v56  }
 0x33d   : > { %1724 = vmatpush3.bf16.msra.mxu0 %v2305_v12 }
 0x33e   : > { %1725 = vmatprep.subr.bf16.mxu0 %v1966_v1 }
 0x341   : > { %1726 = vmatpush3.bf16.msra.mxu0 %v2314_v13 }
 0x342   : > { %1727 = vmatprep.subr.bf16.mxu0 %v1966_v1 }
 0x345   : > { %1728 = vmatpush3.bf16.msra.mxu0 %v2323_v14 }
 0x346   : > { %1755 = vmatprep.subr.bf16.mxu0 %v1966_v1 }
 0x348   : > { %1730 = vmatmul.mubr.bf16.vlgmr.msra.gmra.mrb[12].mxu0 %v958_v41 }
 0x349   : > { %1757 = vmatprep.mubr.msk.bf16.mxu0 %vm1967_vm0, %v1966_v1 }
 0x3a9   : > { %v1082_v21 = vpop.permute.xlu0 %1081 }
 0x3ad   : > { %v1092_v32 = vpop.permute.xlu1 %1091 }
 0x3b1   : > { %v1087_v23 = vpop.permute.xlu0 %1086 }
 0x3b5   : > { %v1097_v49 = vpop.permute.xlu1 %1096 }
 0x3b6   : > { %v1102_v56 = vpop.permute.xlu0 %1101 }
 0x3fb   : > { %v998_v57 = vpop.f32.mrb[8].mxu0 }
 0x3fc   : > { %v1711_v58 = vpop.f32.mrb[9].mxu0 }
 0x3fd   : > { %v1001_v59 = vpop.f32.mrb[10].mxu0 }
 0x3fe   : > { %v1712_v60 = vpop.f32.mrb[11].mxu0 }
 0x41b   : > { %v1039_v61 = vpop.f32.mrb[12].mxu0 }
 0x41c   : > { %v1040_v62 = vadd.f32 %v1039_v61, %v998_v57  ;;  %v1731_v63 = vpop.f32.mrb[13].mxu0 }
 0x41d   : > { %v1042_v0 = vpop.f32.mrb[14].mxu0 }
 0x41e   : > { %v1047_v2 = vadd.f32 1e-05, %v1040_v62  ;;  %v1043_v3 = vadd.f32 %v1042_v0, %v1001_v59  ;;  %v1732_v4 = vpop.f32.mrb[15].mxu0 }
 0x420   : > { %1883 = vrsqrt.f32 %v1047_v2  ;;  %v1048_v5 = vadd.f32 1e-05, %v1043_v3 }
 0x422   : > { %1885 = vrsqrt.f32 %v1048_v5 }
 0x42a   : > { %v1884_v8 = vpop.eup %1883 }
 0x42b   : > { %v1051_v10 = vmul.f32 %v1884_v8, %v2350_v34 }
 0x42c   : > { %v1886_v11 = vpop.eup %1885 }
 0x42d   : > { %v1057_v12 = vmul.f32 %v1056_v7, %v1051_v10  ;;  %v1052_v13 = vmul.f32 %v1886_v11, %v2352_v37 }
 0x42f   : > { %v1063_v14 = vadd.f32 %v1062_v9, %v1057_v12  ;;  %v1058_v15 = vmul.f32 %v1056_v7, %v1052_v13 }
 0x431   : > { %v1078_v16 = vpack.c.bf16 %v1063_v14, %v1063_v14  ;;  %v1064_v17 = vadd.f32 %v1062_v9, %v1058_v15 }
 0x433   : > { %v1129_v18 = vsel %vm1127_vm1, %v1078_v16, 0  ;;  %v1270_v19 = vpack.c.bf16 %v1064_v17, %v1064_v17 }
 0x434   : > { %1734 = vmatpush3.bf16.msra.mxu1 %v1129_v18 }
 0x435   : > { %v1272_v50 = vsel %vm1127_vm1, %v1270_v19, 0  ;;  %1747 = vmatprep.subr.bf16.mxu1 %v1966_v1 }
 0x436   : > { %1756 = vmatpush3.bf16.msra.mxu0 %v1272_v50 }
 0x437   : > { %1736 = vmatmul.mubr.msk.bf16.vlgmr.msra.gmra.mrb[8].mxu1 %vm1117_vm2, %v1880_v51  ;;  %1769 = vmatprep.subr.bf16.mxu0 %v1966_v1 }
 0x438   : > { %1739 = vmatprep.mubr.msk.bf16.mxu1 %vm1967_vm0, %v1966_v1 }
 0x439   : > { %1758 = vmatmul.mubr.msk.bf16.vlgmr.msra.gmra.mrb[16].mxu0 %vm1117_vm2, %v1880_v51 }
 0x43a   : > { %1773 = vmatprep.mubr.msk.bf16.mxu0 %vm1967_vm0, %v1966_v1 }
 0x43f   : > { %1740 = vmatmul.mubr.msk.bf16.gmra.mrb[12].mxu1 %vm1117_vm2, %v1881_v53 }
 0x440   : > { %1743 = vmatprep.mubr.msk.bf16.mxu1 %vm1967_vm0, %v1966_v1 }
 0x447   : > { %1744 = vmatmul.mubr.msk.bf16.gmra.mrb[16].mxu1 %vm1117_vm2, %v1882_v20 }
 0x448   : > { %1751 = vmatprep.mubr.msk.bf16.mxu1 %vm1967_vm0, %v1966_v1 }
 0x50a   : > { %v1165_v22 = vpop.f32.mrb[8].mxu1 }
 0x50b   : > { %v1166_v24 = vadd.f32 %v1165_v22, %v1082_v21  ;;  %v1737_v25 = vpop.f32.mrb[9].mxu1 }
 0x50c   : > { %v1168_v26 = vpop.f32.mrb[10].mxu1  ;;  %v1308_v27 = vpop.f32.mrb[16].mxu0 }
 0x50d   : > { %v1169_v28 = vadd.f32 %v1168_v26, %v1087_v23  ;;  %v1309_v29 = vadd.f32 %v1308_v27, %v1082_v21  ;;  %v1738_v30 = vpop.f32.mrb[11].mxu1  ;;  %v1759_v31 = vpop.f32.mrb[17].mxu0  ;;  %v1187_v34 = vmax.f32 %v1166_v24, 0.0 }
 0x50e   : > { %v1311_v33 = vpop.f32.mrb[18].mxu0  ;;  %v1260_v27 = vpop.permute.xlu1 %1259 }
 0x50f   : > { %v1188_v35 = vmax.f32 %v1169_v28, 0.0  ;;  %v1312_v36 = vadd.f32 %v1311_v33, %v1087_v23  ;;  %v1760_v37 = vpop.f32.mrb[19].mxu0  ;;  %v1330_v39 = vmax.f32 %v1309_v29, 0.0  ;;  %v1266_v29 = vpop.permute.xlu0 %1265 }
 0x511   : > { %v1191_v38 = vpack.c.bf16 %v1188_v35, %v1187_v34  ;;  %v1331_v40 = vmax.f32 %v1312_v36, 0.0 }
 0x512   : > { %v1173_v41 = vpop.f32.mrb[12].mxu1 }
 0x513   : > { %v1334_v42 = vpack.c.bf16 %v1331_v40, %v1330_v39  ;;  %v1174_v43 = vadd.f32 %v1173_v41, %v1092_v32  ;;  %v1741_v44 = vpop.f32.mrb[13].mxu1  ;;  %1748 = vmatpush3.bf16.msra.mxu1 %v1191_v38 }
 0x514   : > { %v1176_v52 = vpop.f32.mrb[14].mxu1  ;;  %1749 = vmatprep.subr.bf16.mxu1 %v1966_v1 }
 0x515   : > { %v1177_v45 = vadd.f32 %v1176_v52, %v1097_v49  ;;  %1770 = vmatpush3.bf16.msra.mxu0 %v1334_v42  ;;  %v1742_v46 = vpop.f32.mrb[15].mxu1  ;;  %v1189_v47 = vmax.f32 %v1174_v43, 0.0 }
 0x516   : > { %1771 = vmatprep.subr.bf16.mxu0 %v1966_v1 }
 0x517   : > { %v1190_v48 = vmax.f32 %v1177_v45, 0.0 }
 0x519   : > { %v1192_v54 = vpack.c.bf16 %v1190_v48, %v1189_v47 }
 0x51b   : > { %1750 = vmatpush3.bf16.msra.mxu1 %v1192_v54 }
 0x51c   : > { %1777 = vmatprep.subr.bf16.mxu1 %v1966_v1 }
 0x51e   : > { %1752 = vmatmul.mubr.msk.bf16.vlgmr.msra.gmra.mrb[16].mxu1 %vm1193_vm3, %v1070_v55 }
 0x51f   : > { %1778 = vmatpush3.bf16.msra.mxu1 %v1272_v50  ;;  %1761 = vmatprep.mubr.msk.bf16.mxu1 %vm1967_vm0, %v1966_v1 }
 0x526   : > { %1762 = vmatmul.mubr.msk.bf16.vlgmr.msra.gmra.mrb[20].mxu1 %vm1117_vm2, %v1881_v53 }
 0x527   : > { %1765 = vmatprep.mubr.msk.bf16.mxu1 %vm1967_vm0, %v1966_v1 }
 0x52e   : > { %1766 = vmatmul.mubr.msk.bf16.gmra.mrb[24].mxu1 %vm1117_vm2, %v1882_v20 }
 0x5f1   : > { %v1231_v57 = vpop.f32.mrb[16].mxu1 }
 0x5f2   : > { %v1779_v58 = vadd.f32 %v1231_v57, %v1102_v56  ;;  %v1753_v59 = vpop.f32.mrb[17].mxu1 }
 0x5f3   : > { %v1234_v60 = vpop.f32.mrb[18].mxu1 }
 0x5f4   : > { %v1237_v61 = vrot.slane %v1779_v58, 4  ;;  %v1754_v62 = vpop.f32.mrb[19].mxu1 }
 0x5f6   : > { %v1238_v63 = vadd.f32 %v1779_v58, %v1237_v61 }
 0x5f8   : > { %v1239_v0 = vrot.slane %v1238_v63, 2 }
 0x5f9   : > { %v1316_v2 = vpop.f32.mrb[20].mxu1 }
 0x5fa   : > { %v1240_v3 = vadd.f32 %v1239_v0, %v1238_v63  ;;  %v1317_v4 = vadd.f32 %v1316_v2, %v1092_v32  ;;  %v1763_v5 = vpop.f32.mrb[21].mxu1 }
 0x5fb   : > { %v1319_v6 = vpop.f32.mrb[22].mxu1 }
 0x5fc   : > { %v1241_v7 = vrot.slane %v1240_v3, 1  ;;  %v1320_v8 = vadd.f32 %v1319_v6, %v1097_v49  ;;  %v1764_v9 = vpop.f32.mrb[23].mxu1  ;;  %v1332_v10 = vmax.f32 %v1317_v4, 0.0 }
 0x5fe   : > { %v1242_v1 = vadd.f32 %v1241_v7, %v1240_v3  ;;  %v1333_v11 = vmax.f32 %v1320_v8, 0.0 }
 0x600   : > { %v1244_v12 = vmul.f32 0.125, %v1242_v1  ;;  %v1335_v13 = vpack.c.bf16 %v1333_v11, %v1332_v10 }
 0x601   : > { %v1324_v14 = vpop.f32.mrb[24].mxu1 }
 0x602   : > { %v1245_v15 = vsub.f32 %v1779_v58, %v1244_v12  ;;  %1772 = vmatpush3.bf16.msra.mxu0 %v1335_v13  ;;  %v1767_v16 = vpop.f32.mrb[25].mxu1  ;;  %v1325_v31 = vadd.f32 %v1324_v14, %v1102_v56 }
 0x603   : > { %v1327_v17 = vpop.f32.mrb[26].mxu1 }
 0x604   : > { %v1246_v18 = vmul.f32 %v1245_v15, %v1245_v15  ;;  %v1768_v19 = vpop.f32.mrb[27].mxu1 }
 0x605   : > { %1774 = vmatmul.mubr.msk.bf16.vlgmr.msra.gmra.mrb[20].mxu0 %vm1193_vm3, %v1070_v55 }
 0x606   : > { %v1247_v51 = vrot.slane %v1246_v18, 4 }
 0x608   : > { %v1248_v50 = vadd.f32 %v1247_v51, %v1246_v18 }
 0x60a   : > { %v1249_v53 = vrot.slane %v1248_v50, 2 }
 0x60c   : > { %v1250_v20 = vadd.f32 %v1249_v53, %v1248_v50 }
 0x60e   : > { %v1251_v21 = vrot.slane %v1250_v20, 1 }
 0x610   : > { %v1252_v22 = vadd.f32 %v1251_v21, %v1250_v20 }
 0x612   : > { %v1253_v23 = vmul.f32 0.125, %v1252_v22 }
 0x614   : > { %v1254_v24 = vadd.f32 1e-05, %v1253_v23 }
 0x616   : > { %1887 = vrsqrt.f32 %v1254_v24 }
 0x620   : > { %v1888_v25 = vpop.eup %1887 }
 0x621   : > { %v1256_v26 = vmul.f32 %v1888_v25, %v1245_v15 }
 0x623   : > { %v1262_v28 = vmul.f32 %v1260_v27, %v1256_v26 }
 0x625   : > { %v1268_v30 = vadd.f32 %v1266_v29, %v1262_v28 }
 0x627   : > { %1269 = vst [vmem:[%s2447_s14] sm:$0xff] %v1268_v30 }
 0x6d8   : > { %v1370_v32 = vpop.f32.mrb[20].mxu0 }
 0x6d9   : > { %v1371_v33 = vadd.f32 %v1370_v32, %v1325_v31  ;;  %v1775_v34 = vpop.f32.mrb[21].mxu0 }
 0x6da   : > { %v1373_v35 = vpop.f32.mrb[22].mxu0 }
 0x6db   : > { %v1376_v36 = vrot.slane %v1371_v33, 4  ;;  %v1776_v37 = vpop.f32.mrb[23].mxu0 }
 0x6dd   : > { %v1377_v38 = vadd.f32 %v1376_v36, %v1371_v33 }
 0x6df   : > { %v1378_v39 = vrot.slane %v1377_v38, 2 }
 0x6e1   : > { %v1379_v40 = vadd.f32 %v1378_v39, %v1377_v38 }
 0x6e3   : > { %v1380_v41 = vrot.slane %v1379_v40, 1 }
 0x6e5   : > { %v1381_v42 = vadd.f32 %v1380_v41, %v1379_v40 }
 0x6e7   : > { %v1382_v43 = vmul.f32 0.125, %v1381_v42 }
 0x6e9   : > { %v1383_v44 = vsub.f32 %v1371_v33, %v1382_v43 }
 0x6eb   : > { %v1384_v49 = vmul.f32 %v1383_v44, %v1383_v44 }
 0x6ed   : > { %v1385_v52 = vrot.slane %v1384_v49, 4 }
 0x6ef   : > { %v1386_v45 = vadd.f32 %v1385_v52, %v1384_v49 }
 0x6f1   : > { %v1387_v46 = vrot.slane %v1386_v45, 2 }
 0x6f3   : > { %v1388_v47 = vadd.f32 %v1387_v46, %v1386_v45 }
 0x6f5   : > { %v1389_v48 = vrot.slane %v1388_v47, 1 }
 0x6f7   : > { %v1390_v54 = vadd.f32 %v1389_v48, %v1388_v47 }
 0x6f9   : > { %v1391_v55 = vmul.f32 0.125, %v1390_v54 }
 0x6fb   : > { %v1392_v56 = vadd.f32 1e-05, %v1391_v55 }
 0x6fd   : > { %1889 = vrsqrt.f32 %v1392_v56 }
 0x707   : > { %v1890_v57 = vpop.eup %1889 }
 0x708   : > { %v1394_v58 = vmul.f32 %v1890_v57, %v1383_v44 }
 0x70a   : > { %v1395_v59 = vmul.f32 %v1394_v58, %v1260_v27 }
 0x70c   : > { %v1396_v60 = vadd.f32 %v1395_v59, %v1266_v29 }
 0x70e   : > { %1549 = vst [vmem:[%s2447_s14 + $0x8] sm:$0xff] %v1396_v60 }
 0x70f PF: > { %s21_s30 = sadd.s32 1, %s1961_s30  }
 0x710   : > { %p18_p7 = scmp.ge.s32.totalorder %s21_s30, 4  }
 0x712   :  { %20 = sbr.rel (!%p18_p7) target bundleno = 2 (0x2), region = 96 }
 0x719   :  { %1421 = vsyncpa [#allocation3], 1 }
 0x71a   :  { %1423 = vsyncpa [#allocation3 + $0x1], 1 }
 0x71b   :  { %1424 = vsyncpa [#allocation5], 1 }

</bundles_post_ra>
